<compile_context>
chip_gen: v7x
topology: tpu7x:2x2x1
jax: 0.10.0
libtpu: 0.0.40
codegen_flags: <defaults>
</compile_context>

<pallas_src>
import jax
import jax.numpy as jnp
from jax.experimental import pallas as pl
from jax.experimental.pallas import tpu as pltpu

SMOOTH = 1.0   # BinaryDiceLoss default smooth=1
POW_P = 2      # BinaryDiceLoss default p=2
# reduction='mean' (default), weight=None, ignore_index=None (module defaults)

_LANES = 128
_VMEM_TILE_BUDGET = 8 * 1024 * 1024  # pipelined-input bytes per step (safe on v5e/v6e/v7x)


def _pick_tile_rows(s_rows, c, itemsize):
    """Largest spatial row-tile that fits the VMEM budget and satisfies the
    (8, 128) block constraint (multiple of 8, or equal to the full dim)."""
    bytes_per_row = c * _LANES * itemsize * 2 * 2  # 2 tensors x 2 pipeline buffers
    max_rows = max(8, _VMEM_TILE_BUDGET // bytes_per_row)
    if s_rows <= max_rows:
        return s_rows
    tr = (max_rows // 8) * 8
    while tr >= 8:
        if s_rows % tr == 0:
            return tr
        tr -= 8
    # TODO(synk): ragged spatial sizes with no 8-multiple divisor fall back to
    # a single whole-S block; add masked partial tiles if this ever matters.
    return s_rows


def _dice_partial_kernel(pred_ref, targ_ref, num_ref, den_ref):
    # pred_ref/targ_ref: (1, C, TILE_ROWS, 128) in VMEM
    # num_ref/den_ref:   (1, C, ACC_ROWS, 128) output blocks, resident across
    #                    the spatial grid axis (accumulators).
    s = pl.program_id(1)

    @pl.when(s == 0)
    def _init():
        num_ref[...] = jnp.zeros_like(num_ref)
        den_ref[...] = jnp.zeros_like(den_ref)

    c_dim = pred_ref.shape[1]
    tile_rows = pred_ref.shape[2]
    acc_rows = num_ref.shape[2]
    folds = tile_rows // acc_rows

    # --- channel softmax as elementwise ops across C spatial slabs (VPU) ---
    logits = [pred_ref[0, c, :, :].astype(jnp.float32) for c in range(c_dim)]
    m = logits[0]
    for c in range(1, c_dim):
        m = jnp.maximum(m, logits[c])
    exps = [jnp.exp(x - m) for x in logits]
    sum_e = exps[0]
    for c in range(1, c_dim):
        sum_e = sum_e + exps[c]
    inv = pl.reciprocal(sum_e, approx=True)  # one EUP reciprocal per position

    # --- per-class Dice partial sums over this spatial tile ---
    for c in range(c_dim):
        sm = exps[c] * inv
        t = targ_ref[0, c, :, :].astype(jnp.float32)
        prod = sm * t              # numerator terms
        den_el = sm * sm + t * t   # p = 2 denominator terms
        if folds > 1:
            # leading-axis fold: whole-vreg adds, stays lane/sublane dense
            prod = jnp.sum(prod.reshape(folds, acc_rows, _LANES), axis=0)
            den_el = jnp.sum(den_el.reshape(folds, acc_rows, _LANES), axis=0)
        num_ref[0, c, :, :] = num_ref[0, c, :, :] + prod
        den_ref[0, c, :, :] = den_ref[0, c, :, :] + den_el


def dice_loss(predict, target, smooth=SMOOTH):
    """predict, target: (N, C, *spatial). Returns scalar f32 Dice loss."""
    assert predict.shape == target.shape, "predict & target shape do not match"
    n, c = int(predict.shape[0]), int(predict.shape[1])
    s = 1
    for d in predict.shape[2:]:
        s *= int(d)
    assert s % _LANES == 0, "flattened spatial size must be a multiple of 128"
    s_rows = s // _LANES

    itemsize = jnp.dtype(predict.dtype).itemsize
    tile_rows = _pick_tile_rows(s_rows, c, itemsize)
    acc_rows = 8 if tile_rows % 8 == 0 else tile_rows
    s_tiles = s_rows // tile_rows

    p4 = predict.reshape(n, c, s_rows, _LANES)
    t4 = target.reshape(n, c, s_rows, _LANES)

    in_spec = pl.BlockSpec((1, c, tile_rows, _LANES),
                           lambda ni, si: (ni, 0, si, 0))
    out_spec = pl.BlockSpec((1, c, acc_rows, _LANES),
                            lambda ni, si: (ni, 0, 0, 0))
    part_shape = jax.ShapeDtypeStruct((n, c, acc_rows, _LANES), jnp.float32)

    cost = pl.CostEstimate(
        flops=10 * n * c * s,
        transcendentals=n * c * s + n * s,          # exp + reciprocal
        bytes_accessed=(p4.size + t4.size) * itemsize
        + 2 * n * c * acc_rows * _LANES * 4,
    )

    num_part, den_part = pl.pallas_call(
        _dice_partial_kernel,
        grid=(n, s_tiles),
        in_specs=[in_spec, in_spec],
        out_specs=(out_spec, out_spec),
        out_shape=(part_shape, part_shape),
        compiler_params=pltpu.CompilerParams(
            dimension_semantics=("parallel", "arbitrary")),
        cost_estimate=cost,
    )(p4, t4)

    # Tiny O(N*C) finalize in plain JAX (keeps the parallel batch grid axis
    # conflict-free across TensorCores; negligible vs. the streamed reduction).
    num = jnp.sum(num_part, axis=(2, 3)) + smooth   # (N, C)
    den = jnp.sum(den_part, axis=(2, 3)) + smooth   # (N, C)
    loss_nc = 1.0 - num / den                       # (N, C)
    # per class: mean over batch; total: sum over classes / C
    return jnp.sum(jnp.mean(loss_nc, axis=0)) / c


def dice_loss_ref(predict, target):
    """Pure-JAX reference matching the PyTorch module semantics."""
    n_b, n_c = predict.shape[0], predict.shape[1]
    p = jax.nn.softmax(predict.astype(jnp.float32), axis=1)
    t = target.astype(jnp.float32)
    pf = p.reshape(n_b, n_c, -1)
    tf = t.reshape(n_b, n_c, -1)
    total = 0.0
    for i in range(n_c):
        num = jnp.sum(pf[:, i] * tf[:, i], axis=1) + SMOOTH
        den = jnp.sum(pf[:, i] ** POW_P + tf[:, i] ** POW_P, axis=1) + SMOOTH
        total = total + jnp.mean(1.0 - num / den)
    return total / n_c


if __name__ == "__main__":
    key = jax.random.PRNGKey(0)
    k1, k2 = jax.random.split(key)

    N, C, H, W = 2, 4, 16, 16
    predict = jax.random.normal(k1, (N, C, H, W), dtype=jnp.float32)
    # one-hot target over channels (the module expects one-hot encoded input)
    cls = jax.random.randint(k2, (N, H, W), 0, C)
    target = jnp.transpose(jax.nn.one_hot(cls, C, dtype=jnp.float32),
                           (0, 3, 1, 2))

    out = dice_loss(predict, target)
    out = jax.block_until_ready(out)

    ref = dice_loss_ref(predict, target)
    # approx reciprocal (EUP vrcp) contributes ~1e-4-level error to the
    # softmax normalization; tolerance reflects that.
    assert jnp.allclose(out, ref, atol=2e-3, rtol=2e-3), (out, ref)

    print("KERNEL_OK")
</pallas_src>

<mosaic_0001>
module attributes {stable_mosaic.version = 11 : i64} {
  func.func @_dice_partial_kernel(%arg0: i32, %arg1: i32, %arg2: memref<1x4x2x128xf32, #tpu.memory_space<vmem>>, %arg3: memref<1x4x2x128xf32, #tpu.memory_space<vmem>>, %arg4: memref<1x4x2x128xf32, #tpu.memory_space<vmem>>, %arg5: memref<1x4x2x128xf32, #tpu.memory_space<vmem>>) attributes {dimension_semantics = [#tpu.dimension_semantics<parallel>, #tpu.dimension_semantics<arbitrary>], iteration_bounds = array<i64: 2, 1>, scalar_prefetch = 0 : i64, scratch_operands = 0 : i64, tpu.core_type = #tpu.core_type<tc>, window_params = [{transform_indices = @transform_0, window_bounds = array<i64: 1, 4, 2, 128>}, {transform_indices = @transform_1, window_bounds = array<i64: 1, 4, 2, 128>}, {transform_indices = @transform_2, window_bounds = array<i64: 1, 4, 2, 128>}, {transform_indices = @transform_3, window_bounds = array<i64: 1, 4, 2, 128>}]} {
    %c0_i32 = arith.constant 0 : i32
    %0 = arith.cmpi eq, %arg1, %c0_i32 : i32
    %1 = arith.extui %0 : i1 to i32
    %c0_i32_0 = arith.constant 0 : i32
    %2 = arith.cmpi ne, %1, %c0_i32_0 : i32
    scf.if %2 {
      %cst = arith.constant 0.000000e+00 : f32
      %102 = vector.broadcast %cst : f32 to vector<1x4x2x128xf32>
      %c0_93 = arith.constant 0 : index
      %c0_94 = arith.constant 0 : index
      %c0_95 = arith.constant 0 : index
      %c0_96 = arith.constant 0 : index
      %103 = vector.load %arg4[%c0_93, %c0_94, %c0_95, %c0_96] : memref<1x4x2x128xf32, #tpu.memory_space<vmem>>, vector<1x4x2x128xf32>
      tpu.vector_store %arg4[%c0_93, %c0_94, %c0_95, %c0_96], %102 {strides = array<i32>} : memref<1x4x2x128xf32, #tpu.memory_space<vmem>>, vector<1x4x2x128xf32>,
      %cst_97 = arith.constant 0.000000e+00 : f32
      %104 = vector.broadcast %cst_97 : f32 to vector<1x4x2x128xf32>
      %c0_98 = arith.constant 0 : index
      %c0_99 = arith.constant 0 : index
      %c0_100 = arith.constant 0 : index
      %c0_101 = arith.constant 0 : index
      %105 = vector.load %arg5[%c0_98, %c0_99, %c0_100, %c0_101] : memref<1x4x2x128xf32, #tpu.memory_space<vmem>>, vector<1x4x2x128xf32>
      tpu.vector_store %arg5[%c0_98, %c0_99, %c0_100, %c0_101], %104 {strides = array<i32>} : memref<1x4x2x128xf32, #tpu.memory_space<vmem>>, vector<1x4x2x128xf32>,
    } else {
    }
    %c0 = arith.constant 0 : index
    %c0_1 = arith.constant 0 : index
    %c0_2 = arith.constant 0 : index
    %c0_3 = arith.constant 0 : index
    %3 = vector.load %arg2[%c0, %c0_1, %c0_2, %c0_3] : memref<1x4x2x128xf32, #tpu.memory_space<vmem>>, vector<1x1x2x128xf32>
    %4 = vector.shape_cast %3 : vector<1x1x2x128xf32> to vector<2x128xf32>
    %c0_4 = arith.constant 0 : index
    %c1 = arith.constant 1 : index
    %c0_5 = arith.constant 0 : index
    %c0_6 = arith.constant 0 : index
    %5 = vector.load %arg2[%c0_4, %c1, %c0_5, %c0_6] : memref<1x4x2x128xf32, #tpu.memory_space<vmem>>, vector<1x1x2x128xf32>
    %6 = vector.shape_cast %5 : vector<1x1x2x128xf32> to vector<2x128xf32>
    %c0_7 = arith.constant 0 : index
    %c2 = arith.constant 2 : index
    %c0_8 = arith.constant 0 : index
    %c0_9 = arith.constant 0 : index
    %7 = vector.load %arg2[%c0_7, %c2, %c0_8, %c0_9] : memref<1x4x2x128xf32, #tpu.memory_space<vmem>>, vector<1x1x2x128xf32>
    %8 = vector.shape_cast %7 : vector<1x1x2x128xf32> to vector<2x128xf32>
    %c0_10 = arith.constant 0 : index
    %c3 = arith.constant 3 : index
    %c0_11 = arith.constant 0 : index
    %c0_12 = arith.constant 0 : index
    %9 = vector.load %arg2[%c0_10, %c3, %c0_11, %c0_12] : memref<1x4x2x128xf32, #tpu.memory_space<vmem>>, vector<1x1x2x128xf32>
    %10 = vector.shape_cast %9 : vector<1x1x2x128xf32> to vector<2x128xf32>
    %11 = arith.maximumf %4, %6 : vector<2x128xf32>
    %12 = arith.maximumf %11, %8 : vector<2x128xf32>
    %13 = arith.maximumf %12, %10 : vector<2x128xf32>
    %14 = arith.subf %4, %13 : vector<2x128xf32>
    %15 = math.exp %14 : vector<2x128xf32>
    %16 = arith.subf %6, %13 : vector<2x128xf32>
    %17 = math.exp %16 : vector<2x128xf32>
    %18 = arith.subf %8, %13 : vector<2x128xf32>
    %19 = math.exp %18 : vector<2x128xf32>
    %20 = arith.subf %10, %13 : vector<2x128xf32>
    %21 = math.exp %20 : vector<2x128xf32>
    %22 = arith.addf %15, %17 : vector<2x128xf32>
    %23 = arith.addf %22, %19 : vector<2x128xf32>
    %24 = arith.addf %23, %21 : vector<2x128xf32>
    %25 = tpu.reciprocal %24 {approx = true} : vector<2x128xf32> -> vector<2x128xf32>
    %26 = arith.mulf %15, %25 : vector<2x128xf32>
    %c0_13 = arith.constant 0 : index
    %c0_14 = arith.constant 0 : index
    %c0_15 = arith.constant 0 : index
    %c0_16 = arith.constant 0 : index
    %27 = vector.load %arg3[%c0_13, %c0_14, %c0_15, %c0_16] : memref<1x4x2x128xf32, #tpu.memory_space<vmem>>, vector<1x1x2x128xf32>
    %28 = vector.shape_cast %27 : vector<1x1x2x128xf32> to vector<2x128xf32>
    %29 = arith.mulf %26, %28 : vector<2x128xf32>
    %30 = arith.mulf %26, %26 : vector<2x128xf32>
    %31 = arith.mulf %28, %28 : vector<2x128xf32>
    %32 = arith.addf %30, %31 : vector<2x128xf32>
    %c0_17 = arith.constant 0 : index
    %c0_18 = arith.constant 0 : index
    %c0_19 = arith.constant 0 : index
    %c0_20 = arith.constant 0 : index
    %33 = vector.load %arg4[%c0_17, %c0_18, %c0_19, %c0_20] : memref<1x4x2x128xf32, #tpu.memory_space<vmem>>, vector<1x1x2x128xf32>
    %34 = vector.shape_cast %33 : vector<1x1x2x128xf32> to vector<2x128xf32>
    %35 = arith.addf %34, %29 : vector<2x128xf32>
    %c0_21 = arith.constant 0 : index
    %c0_22 = arith.constant 0 : index
    %c0_23 = arith.constant 0 : index
    %c0_24 = arith.constant 0 : index
    %36 = vector.load %arg4[%c0_21, %c0_22, %c0_23, %c0_24] : memref<1x4x2x128xf32, #tpu.memory_space<vmem>>, vector<1x1x2x128xf32>
    %37 = vector.shape_cast %36 : vector<1x1x2x128xf32> to vector<2x128xf32>
    %38 = vector.shape_cast %35 : vector<2x128xf32> to vector<1x1x2x128xf32>
    tpu.vector_store %arg4[%c0_21, %c0_22, %c0_23, %c0_24], %38 {strides = array<i32>} : memref<1x4x2x128xf32, #tpu.memory_space<vmem>>, vector<1x1x2x128xf32>,
    %c0_25 = arith.constant 0 : index
    %c0_26 = arith.constant 0 : index
    %c0_27 = arith.constant 0 : index
    %c0_28 = arith.constant 0 : index
    %39 = vector.load %arg5[%c0_25, %c0_26, %c0_27, %c0_28] : memref<1x4x2x128xf32, #tpu.memory_space<vmem>>, vector<1x1x2x128xf32>
    %40 = vector.shape_cast %39 : vector<1x1x2x128xf32> to vector<2x128xf32>
    %41 = arith.addf %40, %32 : vector<2x128xf32>
    %c0_29 = arith.constant 0 : index
    %c0_30 = arith.constant 0 : index
    %c0_31 = arith.constant 0 : index
    %c0_32 = arith.constant 0 : index
    %42 = vector.load %arg5[%c0_29, %c0_30, %c0_31, %c0_32] : memref<1x4x2x128xf32, #tpu.memory_space<vmem>>, vector<1x1x2x128xf32>
    %43 = vector.shape_cast %42 : vector<1x1x2x128xf32> to vector<2x128xf32>
    %44 = vector.shape_cast %41 : vector<2x128xf32> to vector<1x1x2x128xf32>
    tpu.vector_store %arg5[%c0_29, %c0_30, %c0_31, %c0_32], %44 {strides = array<i32>} : memref<1x4x2x128xf32, #tpu.memory_space<vmem>>, vector<1x1x2x128xf32>,
    %45 = arith.mulf %17, %25 : vector<2x128xf32>
    %c0_33 = arith.constant 0 : index
    %c1_34 = arith.constant 1 : index
    %c0_35 = arith.constant 0 : index
    %c0_36 = arith.constant 0 : index
    %46 = vector.load %arg3[%c0_33, %c1_34, %c0_35, %c0_36] : memref<1x4x2x128xf32, #tpu.memory_space<vmem>>, vector<1x1x2x128xf32>
    %47 = vector.shape_cast %46 : vector<1x1x2x128xf32> to vector<2x128xf32>
    %48 = arith.mulf %45, %47 : vector<2x128xf32>
    %49 = arith.mulf %45, %45 : vector<2x128xf32>
    %50 = arith.mulf %47, %47 : vector<2x128xf32>
    %51 = arith.addf %49, %50 : vector<2x128xf32>
    %c0_37 = arith.constant 0 : index
    %c1_38 = arith.constant 1 : index
    %c0_39 = arith.constant 0 : index
    %c0_40 = arith.constant 0 : index
    %52 = vector.load %arg4[%c0_37, %c1_38, %c0_39, %c0_40] : memref<1x4x2x128xf32, #tpu.memory_space<vmem>>, vector<1x1x2x128xf32>
    %53 = vector.shape_cast %52 : vector<1x1x2x128xf32> to vector<2x128xf32>
    %54 = arith.addf %53, %48 : vector<2x128xf32>
    %c0_41 = arith.constant 0 : index
    %c1_42 = arith.constant 1 : index
    %c0_43 = arith.constant 0 : index
    %c0_44 = arith.constant 0 : index
    %55 = vector.load %arg4[%c0_41, %c1_42, %c0_43, %c0_44] : memref<1x4x2x128xf32, #tpu.memory_space<vmem>>, vector<1x1x2x128xf32>
    %56 = vector.shape_cast %55 : vector<1x1x2x128xf32> to vector<2x128xf32>
    %57 = vector.shape_cast %54 : vector<2x128xf32> to vector<1x1x2x128xf32>
    tpu.vector_store %arg4[%c0_41, %c1_42, %c0_43, %c0_44], %57 {strides = array<i32>} : memref<1x4x2x128xf32, #tpu.memory_space<vmem>>, vector<1x1x2x128xf32>,
    %c0_45 = arith.constant 0 : index
    %c1_46 = arith.constant 1 : index
    %c0_47 = arith.constant 0 : index
    %c0_48 = arith.constant 0 : index
    %58 = vector.load %arg5[%c0_45, %c1_46, %c0_47, %c0_48] : memref<1x4x2x128xf32, #tpu.memory_space<vmem>>, vector<1x1x2x128xf32>
    %59 = vector.shape_cast %58 : vector<1x1x2x128xf32> to vector<2x128xf32>
    %60 = arith.addf %59, %51 : vector<2x128xf32>
    %c0_49 = arith.constant 0 : index
    %c1_50 = arith.constant 1 : index
    %c0_51 = arith.constant 0 : index
    %c0_52 = arith.constant 0 : index
    %61 = vector.load %arg5[%c0_49, %c1_50, %c0_51, %c0_52] : memref<1x4x2x128xf32, #tpu.memory_space<vmem>>, vector<1x1x2x128xf32>
    %62 = vector.shape_cast %61 : vector<1x1x2x128xf32> to vector<2x128xf32>
    %63 = vector.shape_cast %60 : vector<2x128xf32> to vector<1x1x2x128xf32>
    tpu.vector_store %arg5[%c0_49, %c1_50, %c0_51, %c0_52], %63 {strides = array<i32>} : memref<1x4x2x128xf32, #tpu.memory_space<vmem>>, vector<1x1x2x128xf32>,
    %64 = arith.mulf %19, %25 : vector<2x128xf32>
    %c0_53 = arith.constant 0 : index
    %c2_54 = arith.constant 2 : index
    %c0_55 = arith.constant 0 : index
    %c0_56 = arith.constant 0 : index
    %65 = vector.load %arg3[%c0_53, %c2_54, %c0_55, %c0_56] : memref<1x4x2x128xf32, #tpu.memory_space<vmem>>, vector<1x1x2x128xf32>
    %66 = vector.shape_cast %65 : vector<1x1x2x128xf32> to vector<2x128xf32>
    %67 = arith.mulf %64, %66 : vector<2x128xf32>
    %68 = arith.mulf %64, %64 : vector<2x128xf32>
    %69 = arith.mulf %66, %66 : vector<2x128xf32>
    %70 = arith.addf %68, %69 : vector<2x128xf32>
    %c0_57 = arith.constant 0 : index
    %c2_58 = arith.constant 2 : index
    %c0_59 = arith.constant 0 : index
    %c0_60 = arith.constant 0 : index
    %71 = vector.load %arg4[%c0_57, %c2_58, %c0_59, %c0_60] : memref<1x4x2x128xf32, #tpu.memory_space<vmem>>, vector<1x1x2x128xf32>
    %72 = vector.shape_cast %71 : vector<1x1x2x128xf32> to vector<2x128xf32>
    %73 = arith.addf %72, %67 : vector<2x128xf32>
    %c0_61 = arith.constant 0 : index
    %c2_62 = arith.constant 2 : index
    %c0_63 = arith.constant 0 : index
    %c0_64 = arith.constant 0 : index
    %74 = vector.load %arg4[%c0_61, %c2_62, %c0_63, %c0_64] : memref<1x4x2x128xf32, #tpu.memory_space<vmem>>, vector<1x1x2x128xf32>
    %75 = vector.shape_cast %74 : vector<1x1x2x128xf32> to vector<2x128xf32>
    %76 = vector.shape_cast %73 : vector<2x128xf32> to vector<1x1x2x128xf32>
    tpu.vector_store %arg4[%c0_61, %c2_62, %c0_63, %c0_64], %76 {strides = array<i32>} : memref<1x4x2x128xf32, #tpu.memory_space<vmem>>, vector<1x1x2x128xf32>,
    %c0_65 = arith.constant 0 : index
    %c2_66 = arith.constant 2 : index
    %c0_67 = arith.constant 0 : index
    %c0_68 = arith.constant 0 : index
    %77 = vector.load %arg5[%c0_65, %c2_66, %c0_67, %c0_68] : memref<1x4x2x128xf32, #tpu.memory_space<vmem>>, vector<1x1x2x128xf32>
    %78 = vector.shape_cast %77 : vector<1x1x2x128xf32> to vector<2x128xf32>
    %79 = arith.addf %78, %70 : vector<2x128xf32>
    %c0_69 = arith.constant 0 : index
    %c2_70 = arith.constant 2 : index
    %c0_71 = arith.constant 0 : index
    %c0_72 = arith.constant 0 : index
    %80 = vector.load %arg5[%c0_69, %c2_70, %c0_71, %c0_72] : memref<1x4x2x128xf32, #tpu.memory_space<vmem>>, vector<1x1x2x128xf32>
    %81 = vector.shape_cast %80 : vector<1x1x2x128xf32> to vector<2x128xf32>
    %82 = vector.shape_cast %79 : vector<2x128xf32> to vector<1x1x2x128xf32>
    tpu.vector_store %arg5[%c0_69, %c2_70, %c0_71, %c0_72], %82 {strides = array<i32>} : memref<1x4x2x128xf32, #tpu.memory_space<vmem>>, vector<1x1x2x128xf32>,
    %83 = arith.mulf %21, %25 : vector<2x128xf32>
    %c0_73 = arith.constant 0 : index
    %c3_74 = arith.constant 3 : index
    %c0_75 = arith.constant 0 : index
    %c0_76 = arith.constant 0 : index
    %84 = vector.load %arg3[%c0_73, %c3_74, %c0_75, %c0_76] : memref<1x4x2x128xf32, #tpu.memory_space<vmem>>, vector<1x1x2x128xf32>
    %85 = vector.shape_cast %84 : vector<1x1x2x128xf32> to vector<2x128xf32>
    %86 = arith.mulf %83, %85 : vector<2x128xf32>
    %87 = arith.mulf %83, %83 : vector<2x128xf32>
    %88 = arith.mulf %85, %85 : vector<2x128xf32>
    %89 = arith.addf %87, %88 : vector<2x128xf32>
    %c0_77 = arith.constant 0 : index
    %c3_78 = arith.constant 3 : index
    %c0_79 = arith.constant 0 : index
    %c0_80 = arith.constant 0 : index
    %90 = vector.load %arg4[%c0_77, %c3_78, %c0_79, %c0_80] : memref<1x4x2x128xf32, #tpu.memory_space<vmem>>, vector<1x1x2x128xf32>
    %91 = vector.shape_cast %90 : vector<1x1x2x128xf32> to vector<2x128xf32>
    %92 = arith.addf %91, %86 : vector<2x128xf32>
    %c0_81 = arith.constant 0 : index
    %c3_82 = arith.constant 3 : index
    %c0_83 = arith.constant 0 : index
    %c0_84 = arith.constant 0 : index
    %93 = vector.load %arg4[%c0_81, %c3_82, %c0_83, %c0_84] : memref<1x4x2x128xf32, #tpu.memory_space<vmem>>, vector<1x1x2x128xf32>
    %94 = vector.shape_cast %93 : vector<1x1x2x128xf32> to vector<2x128xf32>
    %95 = vector.shape_cast %92 : vector<2x128xf32> to vector<1x1x2x128xf32>
    tpu.vector_store %arg4[%c0_81, %c3_82, %c0_83, %c0_84], %95 {strides = array<i32>} : memref<1x4x2x128xf32, #tpu.memory_space<vmem>>, vector<1x1x2x128xf32>,
    %c0_85 = arith.constant 0 : index
    %c3_86 = arith.constant 3 : index
    %c0_87 = arith.constant 0 : index
    %c0_88 = arith.constant 0 : index
    %96 = vector.load %arg5[%c0_85, %c3_86, %c0_87, %c0_88] : memref<1x4x2x128xf32, #tpu.memory_space<vmem>>, vector<1x1x2x128xf32>
    %97 = vector.shape_cast %96 : vector<1x1x2x128xf32> to vector<2x128xf32>
    %98 = arith.addf %97, %89 : vector<2x128xf32>
    %c0_89 = arith.constant 0 : index
    %c3_90 = arith.constant 3 : index
    %c0_91 = arith.constant 0 : index
    %c0_92 = arith.constant 0 : index
    %99 = vector.load %arg5[%c0_89, %c3_90, %c0_91, %c0_92] : memref<1x4x2x128xf32, #tpu.memory_space<vmem>>, vector<1x1x2x128xf32>
    %100 = vector.shape_cast %99 : vector<1x1x2x128xf32> to vector<2x128xf32>
    %101 = vector.shape_cast %98 : vector<2x128xf32> to vector<1x1x2x128xf32>
    tpu.vector_store %arg5[%c0_89, %c3_90, %c0_91, %c0_92], %101 {strides = array<i32>} : memref<1x4x2x128xf32, #tpu.memory_space<vmem>>, vector<1x1x2x128xf32>,
    return
  }
  func.func @transform_0(%arg0: i32, %arg1: i32) -> (i32, i32, i32, i32) {
    %c0_i32 = arith.constant 0 : i32
    %c0_i32_0 = arith.constant 0 : i32
    %c0_i32_1 = arith.constant 0 : i32
    return %arg0, %c0_i32, %arg1, %c0_i32_0 : i32, i32, i32, i32
  }
  func.func @transform_1(%arg0: i32, %arg1: i32) -> (i32, i32, i32, i32) {
    %c0_i32 = arith.constant 0 : i32
    %c0_i32_0 = arith.constant 0 : i32
    %c0_i32_1 = arith.constant 0 : i32
    return %arg0, %c0_i32, %arg1, %c0_i32_0 : i32, i32, i32, i32
  }
  func.func @transform_2(%arg0: i32, %arg1: i32) -> (i32, i32, i32, i32) {
    %c0_i32 = arith.constant 0 : i32
    %c0_i32_0 = arith.constant 0 : i32
    %c0_i32_1 = arith.constant 0 : i32
    %c0_i32_2 = arith.constant 0 : i32
    return %arg0, %c0_i32, %c0_i32_0, %c0_i32_1 : i32, i32, i32, i32
  }
  func.func @transform_3(%arg0: i32, %arg1: i32) -> (i32, i32, i32, i32) {
    %c0_i32 = arith.constant 0 : i32
    %c0_i32_0 = arith.constant 0 : i32
    %c0_i32_1 = arith.constant 0 : i32
    %c0_i32_2 = arith.constant 0 : i32
    return %arg0, %c0_i32, %c0_i32_0, %c0_i32_1 : i32, i32, i32, i32
  }
}

</mosaic_0001>

<bundles_post_ra>
// kernel: tpu_custom_call.1
= control target key start
LH: loop header
LB: loop body
LE: loop exit
PB: predicated region body
PF: predicated region fallthrough
CT: control target
= control target key end

     0   :  { %9 = vsyncpa [#allocation3], 0  ;;  %s1182_s0 = inlined_call_operand.hbm [shape: f32[2,4,2,128], index: 0, kind: input, shape index: {}]   ;;  %s1183_s1 = inlined_call_operand.hbm [shape: f32[2,4,2,128], index: 1, kind: input, shape index: {}]   ;;  %s1184_s2 = inlined_call_operand.hbm [shape: f32[2,4,2,128], index: 2, kind: output, shape index: {0}]   ;;  %s1185_s3 = inlined_call_operand.hbm [shape: f32[2,4,2,128], index: 3, kind: output, shape index: {1}]  }
   0x1   :  { %11 = vsyncpa [#allocation3 + $0x1], 0 }
   0x2   :  { %12 = vsyncpa [#allocation6], 0 }
   0x3   :  { %14 = vsyncpa [#allocation6 + $0x1], 0 }
   0x4   :  { %15 = vsyncpa [#allocation4], 0 }
   0x5   :  { %17 = vsyncpa [#allocation4 + $0x1], 0 }
   0x6   :  { %18 = vsyncpa [#allocation9], 0 }
   0x7   :  { %20 = vsyncpa [#allocation9 + $0x1], 0  ;;  %s869_s12 = smov 0   ;;  %s871_s13 = smov 0  }
   0x8   :  { %s873_s14 = smov 0   ;;  %s875_s15 = smov 0  }
   0x9   :  { %s877_s16 = smov 0   ;;  %s879_s17 = smov 0  }
   0xa LB: > { %s528_s18 = sadd.s32 4294967295, %s838_s17   ;;  %s529_s19 = sadd.s32 4294967294, %s838_s17   ;;  %s838_s17 = sphi %s879_s17, %s26_s17   ;;  %s834_s16 = sphi %s877_s16, %s1203_s16   ;;  %s830_s15 = sphi %s875_s15, %s1202_s15   ;;  %s826_s14 = sphi %s873_s14, %s1201_s14   ;;  %s822_s13 = sphi %s871_s13, %s1200_s13   ;;  %s818_s12 = sphi %s869_s12, %s1199_s12  }
   0xb   : > { %s38_s20 = sadd.s32 1, %s834_s16  ;;  %s47_s21 = sadd.s32 1, %s826_s14 }
   0xc   : > { %p40_p0 = scmp.ge.s32.totalorder %s38_s20, 2  ;;  %p54_p1 = scmp.ne.s32.totalorder %s826_s14, %s822_s13 }
   0xd   : > { %p55_p2 = scmp.eq.s32.totalorder %s838_s17, 0  ;;  %p60_p3 = scmp.ne.s32.totalorder %s822_s13, %s818_s12 }
   0xe   : > { %s1205_s20 = smov (%p40_p0, %s38_s20), 0  ;;  %p61_p5 = scmp.eq.s32.totalorder %s528_s18, 0 }
   0xf   : > { %p910_p4 = por %p55_p2, %p54_p1  ;;  %s42_s23 = ssub.s32 %s834_s16, %s1205_s20 }
  0x10   : > { %p112_p6 = scmp.eq.s32.totalorder %s528_s18, 1  ;;  %p45_p7 = scmp.eq.s32.totalorder %s42_s23, 0 }
  0x11   : > { %p916_p8 = por %p61_p5, %p60_p3  ;;  %p118_p10 = scmp.eq.s32.totalorder %s529_s19, 1 }
  0x12   : > { %p920_p9 = por %p112_p6, %p54_p1  ;;  %p595_p13 = scmp.lt.s32.totalorder %s838_s17, 2 }
  0x13   : > { %s1189_s24 = scalar_select %p916_p8, 1, 0 }
  0x14   : > { %s1190_s25 = scalar_select %p920_p9, 1, 0 }
  0x15   : > { %s925_s26 = scalar_select %p45_p7, %s826_s14, %s47_s21  }
  0x16   : > { %p927_p11 = por %p118_p10, %p60_p3  ;;  %s934_s28 = sand.u32 1, %s826_s14  }
  0x17   : > { %s532_s29 = sshll.u32 %s934_s28, 3  ;;  %s569_s30 = sshll.u32 %s834_s16, 7 }
  0x18   : > { %s1191_s27 = scalar_select %p927_p11, 1, 0 }
  0x19   : > { %s943_s6 = scalar_lea.hbm %s1182_s0, %s569_s30  ;;  %s168_s7 = scalar_lea.vmem [#allocation2], %s532_s29 }
  0x1a   : > { %s176_s8 = sshll.u32 %s168_s7, 4  ;;  %p951_p0 = pnand %p595_p13, %p910_p4  ;;  %s947_s8 = int_to_ptr.vmem [resolvable:$true] %s176_s8 }
  0x1b   : > { %s165_s10 = scalar_lea.sflag [#allocation3], %s934_s28  ;;  %s660_s11 = scalar_lea.hbm %s943_s6, 128 }
  0x1c   : > { %p661_p2 = scmp.ne.s32.totalorder %s943_s6, %s660_s11  ;;  %p662_p3 = pneg %p951_p0 }
  0x1d   : > { %s665_s21 = scalar_lea.hbm %s1182_s0, 256  ;;  %p666_p4 = scmp.lt.u32.totalorder %s943_s6, %s1182_s0 }
  0x1e   : > { %p663_p5 = pnand %p662_p3, %p661_p2  ;;  %p667_p7 = scmp.lt.u32.totalorder %s665_s21, %s660_s11 }
  0x1f   : > { %p669_p13 = scmp.lt.u32.totalorder %s660_s11, %s943_s6 }
  0x20   : > { %p664_p6 = pneg %p663_p5  ;;  %p668_p10 = por %p667_p7, %p666_p4 }
  0x22   : > { %p670_p12 = por %p669_p13, %p668_p10 }
  0x24   : > { %p671_p1 = pnand %p670_p12, %p664_p6 }
  0x26   : > { %674 = shalt.err (!%p671_p1)
}
  0x27   : > { %s675_s4 = scalar_lea.vmem %s947_s8, 128  ;;  %s840_s5 = smov [#allocation2]  }
  0x28   : > { %p676_p2 = scmp.ne.s32.totalorder %s947_s8, %s675_s4  ;;  %s680_s7 = sshll.u32 %s840_s5, 4  ;;  %s681_s7 = int_to_ptr.vmem [resolvable:$false] %s680_s7 }
  0x29   : > { %s682_s18 = scalar_lea.vmem %s681_s7, 256  ;;  %p683_p9 = scmp.lt.s32.totalorder %s947_s8, %s681_s7 }
  0x2a   : > { %p678_p5 = pnand %p676_p2, %p662_p3  ;;  %p684_p4 = scmp.lt.s32.totalorder %s682_s18, %s675_s4 }
  0x2c   : > { %p679_p11 = pneg %p678_p5  ;;  %p685_p7 = por %p684_p4, %p683_p9 }
  0x2e   : > { %p686_p10 = pnand %p685_p7, %p679_p11 }
  0x30   : > { %689 = shalt.err (!%p686_p10)
}
  0x31   : > { %s841_s11 = smov 32   ;;  %s842_s19 = smov 2  }
  0x32   : > { %584 = dma.hbm_to_vmem [thread:$0]  (!%p951_p0), %s943_s6, 128, %s947_s8, %s165_s10, %s841_s11, %s841_s11, %s842_s19  }
  0x33   : > { %p206_p9 = scmp.lt.s32.totalorder %s838_s17, 3  ;;  %s993_s23 = scalar_lea.hbm %s1183_s1, %s569_s30 }
  0x34   : > { %p1193_p11 = scmp.ge.s32.totalorder %s838_s17, 1  ;;  %s190_s5 = scalar_lea.vmem [#allocation5], %s532_s29 }
  0x35   : > { %s198_s7 = sshll.u32 %s190_s5, 4  ;;  %s187_s6 = scalar_lea.sflag [#allocation6], %s934_s28  ;;  %s1003_s7 = int_to_ptr.vmem [resolvable:$true] %s198_s7 }
  0x36   : > { %p997_p12 = pnand %p1193_p11, %p206_p9  ;;  %s690_s8 = scalar_lea.hbm %s993_s23, 128 }
  0x37   : > { %p691_p1 = scmp.ne.s32.totalorder %s993_s23, %s690_s8  ;;  %s695_s18 = scalar_lea.hbm %s1183_s1, 256 }
  0x38   : > { %p696_p2 = scmp.lt.u32.totalorder %s993_s23, %s1183_s1  ;;  %p697_p5 = scmp.lt.u32.totalorder %s695_s18, %s690_s8 }
  0x39   : > { %p693_p6 = pnand %p691_p1, %p662_p3  ;;  %p699_p7 = scmp.lt.u32.totalorder %s690_s8, %s993_s23 }
  0x3a   : > { %p698_p4 = por %p697_p5, %p696_p2 }
  0x3b   : > { %p694_p13 = pneg %p693_p6 }
  0x3c   : > { %p700_p10 = por %p699_p7, %p698_p4 }
  0x3e   : > { %p701_p9 = pnand %p700_p10, %p694_p13 }
  0x40   : > { %704 = shalt.err (!%p701_p9)
}
  0x41   : > { %s705_s29 = scalar_lea.vmem %s1003_s7, 128  ;;  %s843_s5 = smov [#allocation5]  }
  0x42   : > { %p706_p11 = scmp.ne.s32.totalorder %s1003_s7, %s705_s29  ;;  %s710_s30 = sshll.u32 %s843_s5, 4  ;;  %s711_s30 = int_to_ptr.vmem [resolvable:$false] %s710_s30 }
  0x43   : > { %s712_s10 = scalar_lea.vmem %s711_s30, 256  ;;  %p713_p8 = scmp.lt.s32.totalorder %s1003_s7, %s711_s30 }
  0x44   : > { %p708_p1 = pnand %p706_p11, %p662_p3  ;;  %p714_p2 = scmp.lt.s32.totalorder %s712_s10, %s705_s29 }
  0x46   : > { %p709_p6 = pneg %p708_p1  ;;  %p715_p5 = por %p714_p2, %p713_p8 }
  0x48   : > { %p716_p4 = pnand %p715_p5, %p709_p6 }
  0x4a   : > { %719 = shalt.err (!%p716_p4)
}
  0x4b   : > { %587 = dma.hbm_to_vmem [thread:$0]  (!%p951_p0), %s993_s23, 128, %s1003_s7, %s187_s6, %s841_s11, %s841_s11, %s842_s19  }
  0x4c   : > { %210 = sbr.rel (%p997_p12) target bundleno = 173 (0xad), region = 28  ;;  %s1037_s8 = sand.u32 (!%p997_p12), 1, %s822_s13  }
  0x4d   : > { %s539_s18 = sshll.u32 (!%p997_p12), %s1037_s8, 3  ;;  %s213_s21 = scalar_lea.sflag (!%p997_p12), [#allocation3], %s1037_s8 }
  0x4e   : > { %s216_s9 = scalar_lea.vmem (!%p997_p12), [#allocation2], %s539_s18  ;;  %p1195_p8 = scmp.ne.s32.totalorder (!%p997_p12), %s1189_s24, 0 }
  0x53   : > { %801 = dma.done.wait (%p1195_p8), %s213_s21, 128  }
  0x54   : > { %803 = vsyncadd (%p1195_p8), %s213_s21, 4294967168  ;;  %s222_s28 = scalar_lea.sflag [#allocation6], %s1037_s8  ;;  %s1046_s11 = scalar_lea.vmem [#allocation5], %s539_s18 }
  0x55   : > { %805 = dma.done.wait (%p1195_p8), %s222_s28, 128  }
  0x56   : > { %807 = vsyncadd (%p1195_p8), %s222_s28, 4294967168  ;;  %s1052_s19 = scalar_lea.vmem [#allocation7], %s539_s18  ;;  %v844_v0 = vmov 0.0   ;;  %s1058_s23 = scalar_lea.vmem [#allocation8], %s539_s18  ;;  %v270_v1 = vld [vmem:[%s216_s9] sm:$0x3] }
  0x57   : > { %262 = vst [vmem:[%s1052_s19] sm:$0x3] %v844_v0  ;;  %263 = vst [vmem:[%s1052_s19 + $0x2] sm:$0x3] %v844_v0  ;;  %v543_v2 = vld [vmem:[%s216_s9 + $0x2] sm:$0x3]  ;;  %s571_s24 = sshll.u32 %s830_s15, 7 }
  0x58   : > { %264 = vst [vmem:[%s1052_s19 + $0x4] sm:$0x3] %v844_v0  ;;  %265 = vst [vmem:[%s1052_s19 + $0x6] sm:$0x3] %v844_v0  ;;  %v544_v3 = vld [vmem:[%s216_s9 + $0x4] sm:$0x3]  ;;  %v277_v4 = vmax.f32 %v270_v1, %v543_v2  ;;  %s1081_s22 = scalar_lea.hbm %s1184_s2, %s571_s24  ;;  %s1097_s10 = scalar_lea.hbm %s1185_s3, %s571_s24 }
  0x59   : > { %266 = vst [vmem:[%s1058_s23] sm:$0x3] %v844_v0  ;;  %267 = vst [vmem:[%s1058_s23 + $0x2] sm:$0x3] %v844_v0  ;;  %v545_v5 = vld [vmem:[%s216_s9 + $0x6] sm:$0x3]  ;;  %s372_s4 = sshll.u32 %s1052_s19, 4  ;;  %s1085_s4 = int_to_ptr.vmem [resolvable:$true] %s372_s4 }
  0x5a   : > { %268 = vst [vmem:[%s1058_s23 + $0x4] sm:$0x3] %v844_v0  ;;  %269 = vst [vmem:[%s1058_s23 + $0x6] sm:$0x3] %v844_v0  ;;  %v278_v6 = vmax.f32 %v277_v4, %v544_v3  ;;  %v297_v23 = vld [vmem:[%s1046_s11] sm:$0x3] }
  0x5b   : > { %v546_v24 = vld [vmem:[%s1046_s11 + $0x2] sm:$0x3]  ;;  %v551_v25 = vld [vmem:[%s1046_s11 + $0x4] sm:$0x3]  ;;  %v556_v26 = vld [vmem:[%s1046_s11 + $0x6] sm:$0x3]  ;;  %v300_v28 = vmul.f32 %v297_v23, %v297_v23 }
  0x5c   : > { %v279_v7 = vmax.f32 %v278_v6, %v545_v5  ;;  %v313_v29 = vmul.f32 %v546_v24, %v546_v24  ;;  %v328_v36 = vmul.f32 %v551_v25, %v551_v25  ;;  %v343_v37 = vmul.f32 %v556_v26, %v556_v26  ;;  %s388_s29 = sshll.u32 %s1058_s23, 4  ;;  %s354_s18 = scalar_lea.sflag [#allocation4], %s1037_s8  ;;  %s1099_s29 = int_to_ptr.vmem [resolvable:$true] %s388_s29 }
  0x5d   : > { %s720_s21 = scalar_lea.vmem %s1085_s4, 128  ;;  %p1196_p3 = scmp.ne.s32.totalorder %s1190_s25, 0 }
  0x5e   : > { %v280_v8 = vsub.f32 %v270_v1, %v279_v7  ;;  %v283_v9 = vsub.f32 %v543_v2, %v279_v7  ;;  %v286_v10 = vsub.f32 %v544_v3, %v279_v7  ;;  %v289_v11 = vsub.f32 %v545_v5, %v279_v7  ;;  %v302_v34 = vld [vmem:[%s1052_s19] sm:$0x3]  ;;  %v547_v35 = vld [vmem:[%s1052_s19 + $0x2] sm:$0x3]  ;;  %p721_p0 = scmp.ne.s32.totalorder %s1085_s4, %s720_s21  ;;  %s845_s9 = smov [#allocation7]  }
  0x5f   : > { %v552_v42 = vld [vmem:[%s1052_s19 + $0x4] sm:$0x3]  ;;  %v557_v43 = vld [vmem:[%s1052_s19 + $0x6] sm:$0x3]  ;;  %s724_s28 = sshll.u32 %s845_s9, 4  ;;  %s725_s28 = int_to_ptr.vmem [resolvable:$false] %s724_s28 }
  0x60   : > { %v281_v12 = vmul.f32 1.442695, %v280_v8  ;;  %v284_v13 = vmul.f32 1.442695, %v283_v9  ;;  %v287_v14 = vmul.f32 1.442695, %v286_v10  ;;  %p722_p12 = pnand %p721_p0, %p1196_p3  ;;  %p727_p7 = scmp.lt.s32.totalorder %s1085_s4, %s725_s28 }
  0x61   : > { %v290_v15 = vmul.f32 1.442695, %v289_v11  ;;  %v305_v44 = vld [vmem:[%s1058_s23] sm:$0x3]  ;;  %v549_v45 = vld [vmem:[%s1058_s23 + $0x2] sm:$0x3] }
  0x62   : > { %650 = vpow2.f32 %v281_v12  ;;  %v554_v54 = vld [vmem:[%s1058_s23 + $0x4] sm:$0x3]  ;;  %v559_v55 = vld [vmem:[%s1058_s23 + $0x6] sm:$0x3]  ;;  %p723_p13 = pneg %p722_p12  ;;  %s726_s11 = scalar_lea.vmem %s725_s28, 256 }
  0x63   : > { %652 = vpow2.f32 %v284_v13  ;;  %p728_p10 = scmp.lt.s32.totalorder %s726_s11, %s720_s21 }
  0x64   : > { %654 = vpow2.f32 %v287_v14 }
  0x65   : > { %656 = vpow2.f32 %v290_v15  ;;  %p729_p9 = por %p728_p10, %p727_p7 }
  0x67   : > { %p730_p11 = pnand %p729_p9, %p723_p13 }
  0x6c   : > { %v651_v16 = vpop.eup %650 }
  0x6d   : > { %v653_v17 = vpop.eup %652 }
  0x6e   : > { %v655_v18 = vpop.eup %654  ;;  %v292_v19 = vadd.f32 %v653_v17, %v651_v16 }
  0x6f   : > { %v657_v20 = vpop.eup %656 }
  0x70   : > { %v293_v21 = vadd.f32 %v655_v18, %v292_v19 }
  0x72   : > { %v294_v22 = vadd.f32 %v657_v20, %v293_v21 }
  0x74   : > { %658 = vrcp.f32 %v294_v22 }
  0x7e   : > { %v659_v27 = vpop.eup %658 }
  0x7f   : > { %v296_v30 = vmul.f32 %v659_v27, %v651_v16  ;;  %v308_v31 = vmul.f32 %v659_v27, %v653_v17  ;;  %v323_v32 = vmul.f32 %v659_v27, %v655_v18  ;;  %v338_v33 = vmul.f32 %v659_v27, %v657_v20 }
  0x81   : > { %v298_v38 = vmul.f32 %v297_v23, %v296_v30  ;;  %v299_v39 = vmul.f32 %v296_v30, %v296_v30  ;;  %v311_v40 = vmul.f32 %v546_v24, %v308_v31  ;;  %v312_v41 = vmul.f32 %v308_v31, %v308_v31 }
  0x82   : > { %v326_v46 = vmul.f32 %v551_v25, %v323_v32  ;;  %v327_v47 = vmul.f32 %v323_v32, %v323_v32  ;;  %v341_v48 = vmul.f32 %v556_v26, %v338_v33  ;;  %v342_v49 = vmul.f32 %v338_v33, %v338_v33 }
  0x83   : > { %v303_v50 = vadd.f32 %v302_v34, %v298_v38  ;;  %v301_v51 = vadd.f32 %v300_v28, %v299_v39  ;;  %v317_v52 = vadd.f32 %v547_v35, %v311_v40  ;;  %v314_v53 = vadd.f32 %v313_v29, %v312_v41 }
  0x84   : > { %v332_v56 = vadd.f32 %v552_v42, %v326_v46  ;;  %v329_v57 = vadd.f32 %v328_v36, %v327_v47  ;;  %v347_v58 = vadd.f32 %v557_v43, %v341_v48  ;;  %v344_v59 = vadd.f32 %v343_v37, %v342_v49 }
  0x85   : > { %304 = vst [vmem:[%s1052_s19] sm:$0x3] %v303_v50  ;;  %v306_v60 = vadd.f32 %v305_v44, %v301_v51  ;;  %548 = vst [vmem:[%s1052_s19 + $0x2] sm:$0x3] %v317_v52  ;;  %v321_v61 = vadd.f32 %v549_v45, %v314_v53 }
  0x86   : > { %553 = vst [vmem:[%s1052_s19 + $0x4] sm:$0x3] %v332_v56  ;;  %v336_v62 = vadd.f32 %v554_v54, %v329_v57  ;;  %558 = vst [vmem:[%s1052_s19 + $0x6] sm:$0x3] %v347_v58  ;;  %v351_v63 = vadd.f32 %v559_v55, %v344_v59 }
  0x87   : > { %307 = vst [vmem:[%s1058_s23] sm:$0x3] %v306_v60  ;;  %550 = vst [vmem:[%s1058_s23 + $0x2] sm:$0x3] %v321_v61 }
  0x88   : > { %733 = shalt.err (!%p730_p11)
}
  0x89   : > { %s734_s15 = scalar_lea.hbm %s1081_s22, 128  ;;  %s738_s7 = scalar_lea.hbm %s1184_s2, 256 }
  0x8a   : > { %p735_p1 = scmp.ne.s32.totalorder %s1081_s22, %s734_s15  ;;  %p739_p5 = scmp.lt.u32.totalorder %s1081_s22, %s1184_s2 }
  0x8b   : > { %p740_p4 = scmp.lt.u32.totalorder %s738_s7, %s734_s15  ;;  %p742_p0 = scmp.lt.u32.totalorder %s734_s15, %s1081_s22 }
  0x8c   : > { %p736_p6 = pnand %p735_p1, %p1196_p3 }
  0x8d   : > { %p741_p8 = por %p740_p4, %p739_p5 }
  0x8e   : > { %p737_p2 = pneg %p736_p6 }
  0x8f   : > { %p743_p12 = por %p742_p0, %p741_p8 }
  0x91   : > { %p744_p13 = pnand %p743_p12, %p737_p2 }
  0x93   : > { %747 = shalt.err (!%p744_p13)
}
  0x94   : > { %s846_s30 = smov 32   ;;  %s847_s21 = smov 2   ;;  %555 = vst [vmem:[%s1058_s23 + $0x4] sm:$0x3] %v336_v62  ;;  %560 = vst [vmem:[%s1058_s23 + $0x6] sm:$0x3] %v351_v63 }
  0x95   : > { %577 = dma.vmem_to_hbm [thread:$0]  (%p1196_p3), %s1085_s4, 128, %s1081_s22, %s354_s18, %s846_s30, %s846_s30, %s847_s21  }
  0x96   : > { %s359_s9 = scalar_lea.sflag [#allocation9], %s1037_s8  ;;  %s748_s28 = scalar_lea.vmem %s1099_s29, 128 }
  0x97   : > { %p749_p7 = scmp.ne.s32.totalorder %s1099_s29, %s748_s28  ;;  %s848_s11 = smov [#allocation8]  }
  0x98   : > { %s752_s15 = sshll.u32 %s848_s11, 4  ;;  %s753_s15 = int_to_ptr.vmem [resolvable:$false] %s752_s15 }
  0x99   : > { %p750_p10 = pnand %p749_p7, %p1196_p3  ;;  %s754_s19 = scalar_lea.vmem %s753_s15, 256 }
  0x9a   : > { %p755_p11 = scmp.lt.s32.totalorder %s1099_s29, %s753_s15  ;;  %p756_p1 = scmp.lt.s32.totalorder %s754_s19, %s748_s28 }
  0x9b   : > { %p751_p9 = pneg %p750_p10 }
  0x9c   : > { %p757_p6 = por %p756_p1, %p755_p11 }
  0x9e   : > { %p758_p2 = pnand %p757_p6, %p751_p9 }
  0xa0   : > { %761 = shalt.err (!%p758_p2)
}
  0xa1   : > { %s762_s23 = scalar_lea.hbm %s1097_s10, 128  ;;  %s766_s18 = scalar_lea.hbm %s1185_s3, 256 }
  0xa2   : > { %p763_p5 = scmp.ne.s32.totalorder %s1097_s10, %s762_s23  ;;  %p767_p0 = scmp.lt.u32.totalorder %s1097_s10, %s1185_s3 }
  0xa3   : > { %p768_p12 = scmp.lt.u32.totalorder %s766_s18, %s762_s23  ;;  %p770_p7 = scmp.lt.u32.totalorder %s762_s23, %s1097_s10 }
  0xa4   : > { %p764_p4 = pnand %p763_p5, %p1196_p3 }
  0xa5   : > { %p769_p13 = por %p768_p12, %p767_p0 }
  0xa6   : > { %p765_p8 = pneg %p764_p4 }
  0xa7   : > { %p771_p10 = por %p770_p7, %p769_p13 }
  0xa9   : > { %p772_p9 = pnand %p771_p10, %p765_p8 }
  0xab   : > { %775 = shalt.err (!%p772_p9)
}
  0xac   : > { %578 = dma.vmem_to_hbm [thread:$0]  (%p1196_p3), %s1099_s29, 128, %s1097_s10, %s359_s9, %s846_s30, %s846_s30, %s847_s21  }
  0xad PF: > { %s403_s6 = sand.u32 1, %s818_s12   ;;  %p1197_p11 = scmp.ne.s32.totalorder %s1191_s27, 0 }
  0xae   : > { %p1198_p1 = scmp.ge.s32.totalorder %s838_s17, 2  ;;  %s404_s5 = scalar_lea.sflag [#allocation4], %s403_s6 }
  0xb0   : > { %p589_p6 = pnand %p1198_p1, %p1197_p11 }
  0xb2   : > { %809 = dma.done.wait (!%p589_p6), %s404_s5, 128  }
  0xb3   : > { %811 = vsyncadd (!%p589_p6), %s404_s5, 4294967168  ;;  %s413_s25 = scalar_lea.sflag [#allocation9], %s403_s6 }
  0xb4   : > { %813 = dma.done.wait (!%p589_p6), %s413_s25, 128  }
  0xb5   : > { %815 = vsyncadd (!%p589_p6), %s413_s25, 4294967168  ;;  %s26_s17 = sadd.s32 1, %s838_s17   ;;  %s1199_s12 = smov %s822_s13 }
  0xb6   : > { %p23_p2 = scmp.ge.s32.totalorder %s26_s17, 4   ;;  %s1200_s13 = smov %s826_s14 }
  0xb7   : > { %s1201_s14 = smov %s925_s26  ;;  %s1202_s15 = smov %s834_s16 }
  0xb8   : > { %s1203_s16 = smov %s1205_s20  ;;  %25 = sbr.rel (!%p23_p2) target bundleno = 10 (0xa), region = 119 }
  0xbf   :  { %418 = vsyncpa [#allocation3], 1 }
  0xc0   :  { %420 = vsyncpa [#allocation3 + $0x1], 1 }
  0xc1   :  { %421 = vsyncpa [#allocation6], 1 }
  0xc2   :  { %423 = vsyncpa [#allocation6 + $0x1], 1 }
  0xc3   :  { %424 = vsyncpa [#allocation4], 1 }
  0xc4   :  { %426 = vsyncpa [#allocation4 + $0x1], 1 }
  0xc5   :  { %427 = vsyncpa [#allocation9], 1 }
  0xc6   :  { %429 = vsyncpa [#allocation9 + $0x1], 1 }

</bundles_post_ra>
